<compile_context>
chip_gen: v7x
topology: tpu7x:2x2x1
jax: 0.10.0
libtpu: 0.0.40
codegen_flags: <defaults>
</compile_context>

<pallas_src>
import functools
import math

import jax
import jax.numpy as jnp
from jax.experimental import pallas as pl
from jax.experimental.pallas import tpu as pltpu


def _round_up(n, m):
    return ((n + m - 1) // m) * m


def _prenorm_linear_kernel(x_ref, gamma_ref, beta_ref, w_ref, b_ref, o_ref, *,
                           eps, n_sub):
    """out = LayerNorm(x) @ W + b for one (tm, D) row tile."""
    gamma = gamma_ref[...].astype(jnp.float32)   # (1, D)
    beta = beta_ref[...].astype(jnp.float32)     # (1, D)
    bias = b_ref[...].astype(jnp.float32)        # (1, Np)
    w = w_ref[...]                               # (D, Np), MXU operand dtype

    tm, d = x_ref.shape
    inv_d = jnp.float32(1.0 / d)
    sub = tm // n_sub

    # Static sub-block loop: LN (VPU/XLU/EUP) of sub-block k+1 overlaps the
    # MXU matmul of sub-block k, and f32 temporaries are (sub, D) not (tm, D).
    for s in range(n_sub):
        rs = pl.ds(s * sub, sub)
        x = x_ref[rs, :].astype(jnp.float32)
        # One-pass biased statistics (PyTorch LayerNorm semantics, f32).
        mean = jnp.sum(x, axis=-1, keepdims=True) * inv_d
        mean_sq = jnp.sum(x * x, axis=-1, keepdims=True) * inv_d
        var = jnp.maximum(mean_sq - mean * mean, 0.0)
        y = (x - mean) * jax.lax.rsqrt(var + eps) * gamma + beta
        # processor: Linear on the MXU, operands in W's dtype, f32 accumulation.
        out = jnp.dot(y.astype(w.dtype), w, preferred_element_type=jnp.float32)
        o_ref[rs, :] = (out + bias).astype(o_ref.dtype)


def prepare_prenorm_linear_params(gamma, beta, w, b, *, mxu_dtype=jnp.bfloat16):
    """One-time parameter prep (hoisted out of the forward path): pad the
    output dim to a lane-dense multiple of 128 and cast W to the MXU dtype."""
    d, d_out = w.shape
    np_ = _round_up(d_out, 128)
    w_p = jnp.pad(w, ((0, 0), (0, np_ - d_out))).astype(mxu_dtype)
    b_p = jnp.pad(jnp.reshape(b, (1, d_out)), ((0, 0), (0, np_ - d_out)))
    return {
        "gamma": jnp.reshape(gamma, (1, d)),
        "beta": jnp.reshape(beta, (1, d)),
        "w": w_p,
        "b": b_p,
        "d_out": d_out,
    }


def _vmem_limit_bytes(tm, d, np_, x_dtype, w_dtype, out_dtype, n_sub):
    xs = jnp.dtype(x_dtype).itemsize
    ws = jnp.dtype(w_dtype).itemsize
    os_ = jnp.dtype(out_dtype).itemsize
    sub = tm // n_sub
    need = (2 * tm * d * xs          # x tile (double-buffered)
            + 2 * tm * np_ * os_     # out tile (double-buffered)
            + d * np_ * ws           # W (single VMEM copy, resident)
            + (2 * d + np_) * 4      # gamma / beta / bias
            + 6 * sub * d * 4        # f32 LayerNorm temporaries
            + 2 * sub * np_ * 4)     # f32 matmul result temporaries
    need = int(need * 1.25) + (4 << 20)
    return max(32 << 20, min(need, 128 << 20))


def prenorm_linear(x, params, *, eps=1e-5, tile_m=512):
    """Fused PreNorm forward: processor(LayerNorm(x)), processor = Linear.

    x: (..., D); `params` comes from prepare_prenorm_linear_params.
    """
    *lead, d = x.shape
    gamma, beta, w, b = params["gamma"], params["beta"], params["w"], params["b"]
    d_out = params["d_out"]
    assert w.shape[0] == d, (w.shape, d)
    np_ = w.shape[1]

    rows = math.prod(lead) if lead else 1
    x2 = x.reshape(rows, d)

    # Pad rows only to the sublane multiple; Pallas masks the partial last tile.
    row_mult = 16 if x.dtype == jnp.bfloat16 else 8
    rows_p = _round_up(rows, row_mult)
    if rows_p != rows:
        x2 = jnp.pad(x2, ((0, rows_p - rows), (0, 0)))

    # Row tile: <= tile_m, multiple of the sublane packing, and small enough
    # that the grid has >= 4 steps (megacore sharding on v7x + pipelining).
    tm = max(row_mult, min(tile_m, _round_up(pl.cdiv(rows_p, 4), row_mult)))
    n_sub = 1
    for cand in (4, 2):
        if tm % (cand * row_mult) == 0:
            n_sub = cand
            break
    grid_m = pl.cdiv(rows_p, tm)

    out2 = pl.pallas_call(
        functools.partial(_prenorm_linear_kernel, eps=eps, n_sub=n_sub),
        out_shape=jax.ShapeDtypeStruct((rows_p, np_), x.dtype),
        grid_spec=pltpu.PrefetchScalarGridSpec(
            num_scalar_prefetch=0,
            grid=(grid_m,),
            in_specs=[
                # Activations: streamed row tiles, double-buffered by Pallas.
                pl.BlockSpec((tm, d), lambda i: (i, 0)),
                # Grid-invariant operands: whole-array, single VMEM copy.
                pl.BlockSpec(memory_space=pltpu.MemorySpace.VMEM),  # gamma
                pl.BlockSpec(memory_space=pltpu.MemorySpace.VMEM),  # beta
                pl.BlockSpec(memory_space=pltpu.MemorySpace.VMEM),  # W
                pl.BlockSpec(memory_space=pltpu.MemorySpace.VMEM),  # b
            ],
            out_specs=pl.BlockSpec((tm, np_), lambda i: (i, 0)),
        ),
        compiler_params=pltpu.CompilerParams(
            dimension_semantics=("parallel",),
            vmem_limit_bytes=_vmem_limit_bytes(
                tm, d, np_, x.dtype, w.dtype, x.dtype, n_sub)),
    )(x2, gamma, beta, w, b)

    return out2[:rows, :d_out].reshape(*lead, d_out)


def prenorm_linear_ref(x, gamma, beta, w, b, *, eps=1e-5):
    xf = x.astype(jnp.float32)
    mean = jnp.mean(xf, axis=-1, keepdims=True)
    var = jnp.mean((xf - mean) ** 2, axis=-1, keepdims=True)
    y = (xf - mean) * jax.lax.rsqrt(var + eps) * gamma.astype(jnp.float32) \
        + beta.astype(jnp.float32)
    out = y @ w.astype(jnp.float32) + b.astype(jnp.float32)
    return out.astype(x.dtype)


def _run_case(B, S, D, D_out, mxu_dtype, atol, rtol, seed=0):
    key = jax.random.PRNGKey(seed)
    kx, kw, kb, kg, kbt = jax.random.split(key, 5)
    x = jax.random.normal(kx, (B, S, D), dtype=jnp.float32)
    gamma = 1.0 + 0.1 * jax.random.normal(kg, (D,), dtype=jnp.float32)
    beta = 0.1 * jax.random.normal(kbt, (D,), dtype=jnp.float32)
    w = jax.random.normal(kw, (D, D_out), dtype=jnp.float32) / jnp.sqrt(D)
    b = jax.random.normal(kb, (D_out,), dtype=jnp.float32) * 0.01

    params = prepare_prenorm_linear_params(gamma, beta, w, b,
                                           mxu_dtype=mxu_dtype)
    out = jax.block_until_ready(prenorm_linear(x, params))
    ref = prenorm_linear_ref(x, gamma, beta, w, b)
    assert out.shape == (B, S, D_out), out.shape
    err = float(jnp.max(jnp.abs(out - ref)))
    assert jnp.allclose(out, ref, atol=atol, rtol=rtol), err


if __name__ == "__main__":
    # PreNorm over embed_dim with processor = Linear(embed_dim, embed_dim).
    # Unaligned embed_dim (full-dim, non-128 x block), exact f32 MXU path.
    _run_case(B=2, S=8, D=32, D_out=32, mxu_dtype=jnp.float32,
              atol=1e-4, rtol=1e-4)
    # Lane-aligned embed_dim, bf16 MXU operands (production default).
    _run_case(B=2, S=8, D=128, D_out=128, mxu_dtype=jnp.bfloat16,
              atol=2e-2, rtol=2e-2)
    print("KERNEL_OK")
</pallas_src>

<mosaic_0001>
module attributes {stable_mosaic.version = 11 : i64} {
  func.func @_prenorm_linear_kernel(%arg0: i32, %arg1: memref<8x32xf32, #tpu.memory_space<vmem>>, %arg2: memref<1x32xf32, #tpu.memory_space<vmem>>, %arg3: memref<1x32xf32, #tpu.memory_space<vmem>>, %arg4: memref<32x128xf32, #tpu.memory_space<vmem>>, %arg5: memref<1x128xf32, #tpu.memory_space<vmem>>, %arg6: memref<8x128xf32, #tpu.memory_space<vmem>>) attributes {dimension_semantics = [#tpu.dimension_semantics<parallel>], iteration_bounds = array<i64: 2>, scalar_prefetch = 0 : i64, scratch_operands = 0 : i64, tpu.core_type = #tpu.core_type<tc>, window_params = [{transform_indices = @transform_0, window_bounds = array<i64: 8, 32>}, {pipeline_mode = #tpu.pipeline_mode<synchronous>, transform_indices = @transform_1, window_bounds = array<i64: 1, 32>}, {pipeline_mode = #tpu.pipeline_mode<synchronous>, transform_indices = @transform_2, window_bounds = array<i64: 1, 32>}, {pipeline_mode = #tpu.pipeline_mode<synchronous>, transform_indices = @transform_3, window_bounds = array<i64: 32, 128>}, {pipeline_mode = #tpu.pipeline_mode<synchronous>, transform_indices = @transform_4, window_bounds = array<i64: 1, 128>}, {transform_indices = @transform_5, window_bounds = array<i64: 8, 128>}]} {
    %c0 = arith.constant 0 : index
    %c0_0 = arith.constant 0 : index
    %0 = vector.load %arg2[%c0, %c0_0] : memref<1x32xf32, #tpu.memory_space<vmem>>, vector<1x32xf32>
    %c0_1 = arith.constant 0 : index
    %c0_2 = arith.constant 0 : index
    %1 = vector.load %arg3[%c0_1, %c0_2] : memref<1x32xf32, #tpu.memory_space<vmem>>, vector<1x32xf32>
    %c0_3 = arith.constant 0 : index
    %c0_4 = arith.constant 0 : index
    %2 = vector.load %arg5[%c0_3, %c0_4] : memref<1x128xf32, #tpu.memory_space<vmem>>, vector<1x128xf32>
    %c0_5 = arith.constant 0 : index
    %c0_6 = arith.constant 0 : index
    %3 = vector.load %arg4[%c0_5, %c0_6] : memref<32x128xf32, #tpu.memory_space<vmem>>, vector<32x128xf32>
    %c0_7 = arith.constant 0 : index
    %c0_8 = arith.constant 0 : index
    %4 = vector.load %arg1[%c0_7, %c0_8] : memref<8x32xf32, #tpu.memory_space<vmem>>, vector<8x32xf32>
    %cst = arith.constant dense<0.000000e+00> : vector<8xf32>
    %5 = vector.multi_reduction <add>, %4, %cst [1] : vector<8x32xf32> to vector<8xf32>
    %6 = vector.shape_cast %5 : vector<8xf32> to vector<8x1xf32>
    %cst_9 = arith.constant 3.125000e-02 : f32
    %7 = vector.broadcast %cst_9 : f32 to vector<8x1xf32>
    %8 = arith.mulf %6, %7 : vector<8x1xf32>
    %9 = arith.mulf %4, %4 : vector<8x32xf32>
    %cst_10 = arith.constant dense<0.000000e+00> : vector<8xf32>
    %10 = vector.multi_reduction <add>, %9, %cst_10 [1] : vector<8x32xf32> to vector<8xf32>
    %11 = vector.shape_cast %10 : vector<8xf32> to vector<8x1xf32>
    %cst_11 = arith.constant 3.125000e-02 : f32
    %12 = vector.broadcast %cst_11 : f32 to vector<8x1xf32>
    %13 = arith.mulf %11, %12 : vector<8x1xf32>
    %14 = arith.mulf %8, %8 : vector<8x1xf32>
    %15 = arith.subf %13, %14 : vector<8x1xf32>
    %cst_12 = arith.constant 0.000000e+00 : f32
    %16 = vector.broadcast %cst_12 : f32 to vector<8x1xf32>
    %17 = arith.maximumf %15, %16 : vector<8x1xf32>
    %18 = vector.broadcast %8 : vector<8x1xf32> to vector<8x32xf32>
    %19 = arith.subf %4, %18 : vector<8x32xf32>
    %cst_13 = arith.constant 9.99999974E-6 : f32
    %20 = vector.broadcast %cst_13 : f32 to vector<8x1xf32>
    %21 = arith.addf %17, %20 : vector<8x1xf32>
    %22 = math.rsqrt %21 : vector<8x1xf32>
    %23 = vector.broadcast %22 : vector<8x1xf32> to vector<8x32xf32>
    %24 = arith.mulf %19, %23 : vector<8x32xf32>
    %25 = vector.broadcast %0 : vector<1x32xf32> to vector<8x32xf32>
    %26 = arith.mulf %24, %25 : vector<8x32xf32>
    %27 = vector.broadcast %1 : vector<1x32xf32> to vector<8x32xf32>
    %28 = arith.addf %26, %27 : vector<8x32xf32>
    %cst_14 = arith.constant dense<0.000000e+00> : vector<8x128xf32>
    %29 = tpu.matmul %28, %3, %cst_14 {dimension_numbers = #tpu.dot_dimension_numbers<[1], [0], [0], [1], [0, 0, 1, 1], [], []>} : vector<8x32xf32>, vector<32x128xf32>, vector<8x128xf32> -> vector<8x128xf32>
    %30 = vector.broadcast %2 : vector<1x128xf32> to vector<8x128xf32>
    %31 = arith.addf %29, %30 : vector<8x128xf32>
    %c0_15 = arith.constant 0 : index
    %c0_16 = arith.constant 0 : index
    %32 = vector.load %arg6[%c0_15, %c0_16] : memref<8x128xf32, #tpu.memory_space<vmem>>, vector<8x128xf32>
    tpu.vector_store %arg6[%c0_15, %c0_16], %31 {strides = array<i32>} : memref<8x128xf32, #tpu.memory_space<vmem>>, vector<8x128xf32>,
    return
  }
  func.func @transform_0(%arg0: i32) -> (i32, i32) {
    %c0_i32 = arith.constant 0 : i32
    %c0_i32_0 = arith.constant 0 : i32
    return %arg0, %c0_i32 : i32, i32
  }
  func.func @transform_1(%arg0: i32) -> (i32, i32) {
    %c0_i32 = arith.constant 0 : i32
    %c0_i32_0 = arith.constant 0 : i32
    %c0_i32_1 = arith.constant 0 : i32
    return %c0_i32, %c0_i32_0 : i32, i32
  }
  func.func @transform_2(%arg0: i32) -> (i32, i32) {
    %c0_i32 = arith.constant 0 : i32
    %c0_i32_0 = arith.constant 0 : i32
    %c0_i32_1 = arith.constant 0 : i32
    return %c0_i32, %c0_i32_0 : i32, i32
  }
  func.func @transform_3(%arg0: i32) -> (i32, i32) {
    %c0_i32 = arith.constant 0 : i32
    %c0_i32_0 = arith.constant 0 : i32
    %c0_i32_1 = arith.constant 0 : i32
    return %c0_i32, %c0_i32_0 : i32, i32
  }
  func.func @transform_4(%arg0: i32) -> (i32, i32) {
    %c0_i32 = arith.constant 0 : i32
    %c0_i32_0 = arith.constant 0 : i32
    %c0_i32_1 = arith.constant 0 : i32
    return %c0_i32, %c0_i32_0 : i32, i32
  }
  func.func @transform_5(%arg0: i32) -> (i32, i32) {
    %c0_i32 = arith.constant 0 : i32
    %c0_i32_0 = arith.constant 0 : i32
    return %arg0, %c0_i32 : i32, i32
  }
}

</mosaic_0001>

<bundles_post_ra>
// kernel: tpu_custom_call.1
= control target key start
LH: loop header
LB: loop body
LE: loop exit
PB: predicated region body
PF: predicated region fallthrough
CT: control target
= control target key end

     0   :  { %10 = vsyncpa [#allocation3], 0  ;;  %s952_s0 = inlined_call_operand.hbm [shape: f32[16,32], index: 0, kind: input, shape index: {}]   ;;  %s953_s1 = inlined_call_operand.vmem [shape: f32[1,32], index: 1, kind: input, shape index: {}]   ;;  %s954_s2 = inlined_call_operand.vmem [shape: f32[1,32], index: 2, kind: input, shape index: {}]   ;;  %s955_s3 = inlined_call_operand.hbm [shape: f32[32,128], index: 3, kind: input, shape index: {}]   ;;  %s956_s4 = inlined_call_operand.vmem [shape: f32[1,128], index: 4, kind: input, shape index: {}]   ;;  %s957_s5 = inlined_call_operand.hbm [shape: f32[16,128], index: 5, kind: output, shape index: {}]  }
   0x1   :  { %12 = vsyncpa [#allocation3 + $0x1], 0 }
   0x2   :  { %13 = vsyncpa [#allocation6], 0 }
   0x3   :  { %14 = vsyncpa [#allocation4], 0 }
   0x4   :  { %16 = vsyncpa [#allocation4 + $0x1], 0  ;;  %s740_s18 = smov 0   ;;  %s742_s19 = smov 0  }
   0x5   :  { %s744_s20 = smov 0   ;;  %s746_s21 = smov 0  }
   0x6 LB: > { %s761_s22 = sadd.s32 4294967295, %s700_s21   ;;  %s468_s23 = sadd.s32 4294967294, %s700_s21   ;;  %s700_s21 = sphi %s746_s21, %s977_s21   ;;  %s696_s20 = sphi %s744_s20, %s976_s20   ;;  %s692_s19 = sphi %s742_s19, %s975_s19   ;;  %s688_s18 = sphi %s740_s18, %s974_s18  }
   0x7   : > { %p42_p0 = scmp.ne.s32.totalorder %s692_s19, %s688_s18  ;;  %p958_p1 = scmp.eq.s32.totalorder %s761_s22, 0 }
   0x8   : > { %p156_p3 = scmp.eq.s32.totalorder %s468_s23, 1  ;;  %p469_p5 = scmp.ge.s32.totalorder %s700_s21, 1 }
   0x9   : > { %p770_p4 = por %p958_p1, %p42_p0  ;;  %p163_p7 = scmp.lt.s32.totalorder %s700_s21, 3 }
   0xa   : > { %p775_p6 = por %p156_p3, %p42_p0  ;;  %s702_s27 = smov [#allocation5]  }
   0xb   : > { %s961_s24 = scalar_select %p770_p4, 1, 0 }
   0xc   : > { %s962_s25 = scalar_select %p775_p6, 1, 0 }
   0xd   : > { %p780_p8 = pnand %p469_p5, %p163_p7  ;;  %s181_s28 = sshll.u32 %s702_s27, 4  ;;  %s784_s28 = int_to_ptr.vmem [resolvable:$true] %s181_s28 }
   0xe   : > { %s796_s30 = sadd.s32 1, %s700_s21   ;;  %s29_s6 = sadd.s32 1, %s696_s20 }
   0xf   : > { %s963_s26 = scalar_select %p780_p8, 1, 0 }
  0x10   : > { %p516_p9 = pneg %p780_p8  ;;  %s26_s7 = ssub.s32 %s700_s21, %s796_s30 }
  0x11   : > { %s572_s10 = scalar_lea.hbm %s955_s3, 512 }
  0x12   : > { %p791_p11 = pnand %p516_p9, %p958_p1  ;;  %p573_p12 = scmp.ne.s32.totalorder %s955_s3, %s572_s10 }
  0x13   : > { %p579_p5 = scmp.lt.u32.totalorder %s572_s10, %s955_s3 }
  0x14   : > { %p574_p13 = pneg %p791_p11 }
  0x16   : > { %p575_p0 = pnand %p574_p13, %p573_p12 }
  0x18   : > { %p576_p3 = pneg %p575_p0 }
  0x1a   : > { %p581_p7 = pnand %p579_p5, %p576_p3 }
  0x1c   : > { %584 = shalt.err (!%p581_p7)
}
  0x1d   : > { %s585_s15 = scalar_lea.vmem %s784_s28, 512  ;;  %p593_p2 = scmp.lt.s32.totalorder %s784_s28, %s784_s28 }
  0x1e   : > { %p586_p9 = scmp.ne.s32.totalorder %s784_s28, %s585_s15  ;;  %p594_p6 = scmp.lt.s32.totalorder %s585_s15, %s585_s15 }
  0x20   : > { %p588_p10 = pnand %p586_p9, %p574_p13  ;;  %p595_p4 = por %p594_p6, %p593_p2 }
  0x22   : > { %p589_p1 = pneg %p588_p10 }
  0x24   : > { %p596_p8 = pnand %p595_p4, %p589_p1 }
  0x26   : > { %599 = shalt.err (!%p596_p8)
}
  0x27   : > { %s703_s16 = smov 128   ;;  %s704_s17 = smov 8  }
  0x28   : > { %519 = dma.hbm_to_vmem [thread:$0]  (!%p791_p11), %s955_s3, 512, %s784_s28, [#allocation6], %s703_s16, %s703_s16, %s704_s17  }
  0x29   : > { %p27_p2 = scmp.eq.s32.totalorder %s26_s7, 0  ;;  %p36_p1 = scmp.ne.s32.totalorder %s696_s20, %s692_s19 }
  0x2a   : > { %p37_p4 = scmp.eq.s32.totalorder %s700_s21, 0  ;;  %p529_p6 = scmp.lt.s32.totalorder %s700_s21, 2 }
  0x2b   : > { %s827_s8 = scalar_select %p27_p2, %s696_s20, %s29_s6  }
  0x2c   : > { %p38_p8 = por %p37_p4, %p36_p1  ;;  %p965_p10 = scmp.eq.s32.totalorder %s761_s22, 1 }
  0x2d   : > { %s198_s10 = sand.u32 1, %s696_s20   ;;  %s473_s11 = sshll.u32 %s700_s21, 7 }
  0x2e   : > { %p831_p12 = por %p965_p10, %p36_p1  ;;  %s472_s12 = sshll.u32 %s198_s10, 3 }
  0x2f   : > { %s840_s14 = scalar_lea.hbm %s952_s0, %s473_s11  ;;  %s202_s28 = scalar_lea.vmem [#allocation2], %s472_s12 }
  0x30   : > { %s209_s6 = sshll.u32 %s202_s28, 4  ;;  %p842_p11 = pnand %p529_p6, %p38_p8  ;;  %s846_s6 = int_to_ptr.vmem [resolvable:$true] %s209_s6 }
  0x31   : > { %s199_s15 = scalar_lea.sflag [#allocation3], %s198_s10  ;;  %s600_s16 = scalar_lea.hbm %s840_s14, 128 }
  0x32   : > { %p601_p13 = scmp.ne.s32.totalorder %s840_s14, %s600_s16  ;;  %p602_p0 = pneg %p842_p11 }
  0x33   : > { %s605_s27 = scalar_lea.hbm %s952_s0, 256  ;;  %p606_p7 = scmp.lt.u32.totalorder %s840_s14, %s952_s0 }
  0x34   : > { %p603_p3 = pnand %p602_p0, %p601_p13  ;;  %p607_p9 = scmp.lt.u32.totalorder %s605_s27, %s600_s16 }
  0x35   : > { %p609_p1 = scmp.lt.u32.totalorder %s600_s16, %s840_s14 }
  0x36   : > { %p604_p5 = pneg %p603_p3  ;;  %p608_p2 = por %p607_p9, %p606_p7 }
  0x38   : > { %p610_p4 = por %p609_p1, %p608_p2 }
  0x3a   : > { %p611_p6 = pnand %p610_p4, %p604_p5 }
  0x3c   : > { %614 = shalt.err (!%p611_p6)
}
  0x3d   : > { %s615_s10 = scalar_lea.vmem %s846_s6, 128  ;;  %s705_s29 = smov [#allocation2]  }
  0x3e   : > { %p616_p8 = scmp.ne.s32.totalorder %s846_s6, %s615_s10  ;;  %s620_s13 = sshll.u32 %s705_s29, 4  ;;  %s621_s13 = int_to_ptr.vmem [resolvable:$false] %s620_s13 }
  0x3f   : > { %s622_s28 = scalar_lea.vmem %s621_s13, 256  ;;  %p623_p3 = scmp.lt.s32.totalorder %s846_s6, %s621_s13 }
  0x40   : > { %p618_p10 = pnand %p616_p8, %p602_p0  ;;  %p624_p7 = scmp.lt.s32.totalorder %s622_s28, %s615_s10 }
  0x42   : > { %p619_p13 = pneg %p618_p10  ;;  %p625_p9 = por %p624_p7, %p623_p3 }
  0x44   : > { %p626_p2 = pnand %p625_p9, %p619_p13 }
  0x46   : > { %629 = shalt.err (!%p626_p2)
}
  0x47   : > { %523 = dma.hbm_to_vmem [thread:$0]  (!%p842_p11), %s840_s14, 128, %s846_s6, %s199_s15  }
  0x48   : > { %p968_p5 = scmp.ne.s32.totalorder %s963_s26, 0 }
  0x49   : > { %s876_s16 = sand.u32 (!%p968_p5), 1, %s692_s19   ;;  %p969_p0 = scmp.ne.s32.totalorder (!%p968_p5), %s961_s24, 0 }
  0x4a   : > { %218 = sbr.rel (%p968_p5) target bundleno = 486 (0x1e6), region = 40  ;;  %s475_s17 = sshll.u32 (!%p968_p5), %s876_s16, 3 }
  0x4b   : > { %s221_s23 = scalar_lea.sflag (!%p968_p5), [#allocation3], %s876_s16  ;;  %s224_s27 = scalar_lea.vmem (!%p968_p5), [#allocation2], %s475_s17 }
  0x51   : > { %675 = dma.done.wait (%p969_p0), %s221_s23, 128  }
  0x52   : > { %677 = vsyncadd (%p969_p0), %s221_s23, 4294967168  ;;  %p970_p11 = scmp.eq.s32.totalorder %s761_s22, 0 }
  0x54   : > { %679 = dma.done.wait (%p970_p11), [#allocation6], 512   ;;  %p971_p1 = pmov %p970_p11 }
  0x55   : > { %vm263_vm0 = vcmask 261120   ;;  %v262_v0 = vld [vmem:[%s224_s27] sm:$0xff]  ;;  %v258_v4 = vld [vmem:[#allocation5] sm:$0xff]  ;;  %v259_v5 = vld [vmem:[#allocation5 + $0x8] sm:$0xff]  ;;  %v706_v7 = vmov 0.0|0.0   ;;  %vm707_vm1 = vmmov 0  }
  0x56   : > { %681 = vsyncadd (%p971_p1), [#allocation6], 4294966784  ;;  %v264_v1 = vsel %vm263_vm0, %v262_v0, 0.0  ;;  %v268_v2 = vmul.f32 %v262_v0, %v262_v0  ;;  %v260_v6 = vld [vmem:[#allocation5 + $0x10] sm:$0xff]  ;;  %502 = vmatprep.subr.bf16.mxu0 %v706_v7  ;;  %v503_v8 = vpack.c.bf16 %v259_v5, %v258_v4  ;;  %v261_v9 = vld [vmem:[#allocation5 + $0x18] sm:$0xff]  ;;  %v708_v10 = vmov 0.0  }
  0x57   : > { %265 = vadd.xlane.f32.xlu0 %v264_v1  ;;  %499 = vmatprep.mubr.msk.f32.mxu0 %vm707_vm1, %v708_v10  ;;  %v506_v11 = vpack.c.bf16 %v261_v9, %v260_v6  ;;  %v478_v22 = vld [vmem:[%s953_s1] ss:$0 sm:$0xff]  ;;  %s483_s11 = sshll.u32 %s761_s22, 7  ;;  %s254_s12 = scalar_lea.vmem [#allocation7], %s475_s17 }
  0x58   : > { %v269_v3 = vsel %vm263_vm0, %v268_v2, 0.0  ;;  %504 = vmatpush3.bf16.msra.mxu0 %v503_v8  ;;  %v479_v24 = vld [vmem:[%s954_s2] ss:$0 sm:$0xff]  ;;  %s388_s10 = sshll.u32 %s254_s12, 4  ;;  %s908_s28 = scalar_lea.hbm %s957_s5, %s483_s11  ;;  %s910_s10 = int_to_ptr.vmem [resolvable:$true] %s388_s10 }
  0x59   : > { %505 = vmatprep.subr.bf16.mxu0 %v706_v7  ;;  %v480_v27 = vld [vmem:[%s956_s4] ss:$0 sm:$0xff]  ;;  %s375_s23 = scalar_lea.sflag [#allocation4], %s876_s16  ;;  %s630_s27 = scalar_lea.vmem %s910_s10, 128 }
  0x5a   : > { %p631_p4 = scmp.ne.s32.totalorder %s910_s10, %s630_s27  ;;  %s709_s22 = smov [#allocation7]  }
  0x5b   : > { %270 = vadd.xlane.f32.xlu0 %v269_v3  ;;  %s634_s17 = sshll.u32 %s709_s22, 4  ;;  %s635_s17 = int_to_ptr.vmem [resolvable:$false] %s634_s17 }
  0x5c   : > { %507 = vmatpush3.bf16.msra.mxu0 %v506_v11  ;;  %p632_p6 = pnand %p631_p4, %p831_p12  ;;  %s636_s24 = scalar_lea.vmem %s635_s17, 256 }
  0x5d   : > { %p637_p10 = scmp.lt.s32.totalorder %s910_s10, %s635_s17  ;;  %p638_p13 = scmp.lt.s32.totalorder %s636_s24, %s630_s27 }
  0x5e   : > { %p633_p8 = pneg %p632_p6 }
  0x5f   : > { %p639_p3 = por %p638_p13, %p637_p10 }
  0x61   : > { %p640_p7 = pnand %p639_p3, %p633_p8 }
  0xe4   : > { %v266_v12 = vpop.xlane.xlu0 %265 }
  0xe5   : > { %v267_v13 = vmul.f32 0.03125, %v266_v12 }
  0xe7   : > { %v273_v15 = vmul.f32 %v267_v13, %v267_v13  ;;  %v276_v20 = vsub.f32 %v262_v0, %v267_v13 }
  0xe8   : > { %v271_v14 = vpop.xlane.xlu0 %270 }
  0xe9   : > { %v272_v16 = vmul.f32 0.03125, %v271_v14 }
  0xeb   : > { %v274_v17 = vsub.f32 %v272_v16, %v273_v15 }
  0xed   : > { %v275_v18 = vmax.f32 %v274_v17, 0.0 }
  0xef   : > { %v277_v19 = vadd.f32 1e-05, %v275_v18 }
  0xf1   : > { %570 = vrsqrt.f32 %v277_v19 }
  0xfb   : > { %v571_v21 = vpop.eup %570 }
  0xfc   : > { %v279_v23 = vmul.f32 %v571_v21, %v276_v20 }
  0xfe   : > { %v286_v25 = vmul.f32 %v478_v22, %v279_v23 }
 0x100   : > { %v293_v26 = vadd.f32 %v479_v24, %v286_v25 }
 0x102   : > { %500 = vmatmul.mubr.msk.f32.vlgmr.msra.gmra.mrb[0].mxu0 %vm263_vm0, %v293_v26 }
 0x1d5   : > { %v369_v28 = vpop.f32.mrb[0].mxu0 }
 0x1d6   : > { %v370_v29 = vadd.f32 %v480_v27, %v369_v28  ;;  %v501_v30 = vpop.f32.mrb[1].mxu0 }
 0x1d8   : > { %373 = vst [vmem:[%s254_s12] sm:$0xff] %v370_v29 }
 0x1d9   : > { %643 = shalt.err (!%p640_p7)
}
 0x1da   : > { %s644_s16 = scalar_lea.hbm %s908_s28, 128  ;;  %s648_s6 = scalar_lea.hbm %s957_s5, 256 }
 0x1db   : > { %p645_p9 = scmp.ne.s32.totalorder %s908_s28, %s644_s16  ;;  %p649_p0 = scmp.lt.u32.totalorder %s908_s28, %s957_s5 }
 0x1dc   : > { %p650_p11 = scmp.lt.u32.totalorder %s648_s6, %s644_s16  ;;  %p652_p4 = scmp.lt.u32.totalorder %s644_s16, %s908_s28 }
 0x1dd   : > { %p646_p2 = pnand %p645_p9, %p831_p12 }
 0x1de   : > { %p651_p1 = por %p650_p11, %p649_p0 }
 0x1df   : > { %p647_p5 = pneg %p646_p2 }
 0x1e0   : > { %p653_p6 = por %p652_p4, %p651_p1 }
 0x1e2   : > { %p654_p8 = pnand %p653_p6, %p647_p5 }
 0x1e4   : > { %657 = shalt.err (!%p654_p8)
}
 0x1e5   : > { %514 = dma.vmem_to_hbm [thread:$0]  (%p831_p12), %s910_s10, 128, %s908_s28, %s375_s23  }
 0x1e6 PF: > { %s400_s11 = sand.u32 1, %s688_s18   ;;  %p972_p10 = scmp.ne.s32.totalorder %s962_s25, 0 }
 0x1e7   : > { %p973_p13 = scmp.ge.s32.totalorder %s700_s21, 2  ;;  %s401_s12 = scalar_lea.sflag [#allocation4], %s400_s11 }
 0x1e9   : > { %p525_p3 = pnand %p973_p13, %p972_p10 }
 0x1eb   : > { %683 = dma.done.wait (!%p525_p3), %s401_s12, 128  }
 0x1ec   : > { %685 = vsyncadd (!%p525_p3), %s401_s12, 4294967168  ;;  %p19_p7 = scmp.ge.s32.totalorder %s796_s30, 4   ;;  %s974_s18 = smov %s692_s19 }
 0x1ed   : > { %s975_s19 = smov %s696_s20  ;;  %s976_s20 = smov %s827_s8 }
 0x1ee   : > { %s977_s21 = smov %s796_s30  ;;  %21 = sbr.rel (!%p19_p7) target bundleno = 6 (0x6), region = 89 }
 0x1f5   :  { %406 = vsyncpa [#allocation3], 1 }
 0x1f6   :  { %408 = vsyncpa [#allocation3 + $0x1], 1 }
 0x1f7   :  { %409 = vsyncpa [#allocation6], 1 }
 0x1f8   :  { %410 = vsyncpa [#allocation4], 1 }
 0x1f9   :  { %412 = vsyncpa [#allocation4 + $0x1], 1 }

</bundles_post_ra>
